<compile_context>
chip_gen: v7x
topology: tpu7x:2x2x1
jax: 0.10.0
libtpu: 0.0.40
codegen_flags: <defaults>
</compile_context>

<pallas_src>
import jax
import jax.numpy as jnp
from jax.experimental import pallas as pl
from jax.experimental.pallas import tpu as pltpu


# ----------------------------- model config ---------------------------------
N_DIM = 4          # n_dim
INPUT_DIM = 8      # input_dim  -> flattened input = input_dim * n_dim = 32
HIDDEN_DIM = 32    # hidden_dim
OUTPUT_DIM = 4     # output_dim -> flattened output = output_dim * n_dim = 16
NUM_LAYERS = 2     # num_layers (extra hidden blocks) -> 3 hidden blocks total
BN_EPS = 1e-5

IN_FEATS = INPUT_DIM * N_DIM      # 32
OUT_FEATS = OUTPUT_DIM * N_DIM    # 16
N_HIDDEN_BLOCKS = 1 + NUM_LAYERS  # 3
N_MATMULS = N_HIDDEN_BLOCKS + 1   # 4 (3 hidden + output linear)

# packed-slab dims (IN_FEATS == HIDDEN_DIM == 32 for this config)
SLAB_K = max(IN_FEATS, HIDDEN_DIM)            # 32  (contraction dim)
SLAB_N = max(HIDDEN_DIM, OUT_FEATS)           # 32  (output dim; out cols 16..31 are zero pad)
assert IN_FEATS == SLAB_K, "kernel assumes layer-0 K equals the slab K"

MAX_BATCH_TILE = 1024             # rows per grid step (sublane = 8 for f32)


def _round8(n):
    return -(-n // 8) * 8


# ------------------------------ Pallas kernel --------------------------------
def pred_mlp_kernel(x_ref, w_ref, s_ref, o_ref):
    # x_ref : (batch_tile, 32) f32        activations
    # w_ref : (N_MATMULS, 32, 32) bf16    folded weights (output layer zero-padded to 32 cols)
    # s_ref : (N_MATMULS, 1, 32) f32      folded shifts (bias*scale + shift; plain bias for out)
    # o_ref : (batch_tile, 32) f32        output (first OUT_FEATS cols are real)
    h = x_ref[...]
    for l in range(N_HIDDEN_BLOCKS):
        acc = jnp.dot(h.astype(jnp.bfloat16), w_ref[l],
                      preferred_element_type=jnp.float32)
        h = jnp.maximum(acc + s_ref[l], 0.0)   # ReLU; Dropout = identity in eval mode
    o_ref[...] = (
        jnp.dot(h.astype(jnp.bfloat16), w_ref[N_HIDDEN_BLOCKS],
                preferred_element_type=jnp.float32)
        + s_ref[N_HIDDEN_BLOCKS]
    )


# --------------------------- host-side param packing -------------------------
def pack_params(params):
    """Fold bias + BN(eval) into weights; pack into one (4,32,32) bf16 slab
    and one (4,1,32) f32 shift slab."""
    (w0, b0, s0, t0,
     w1, b1, s1, t1,
     w2, b2, s2, t2,
     wo, bo) = params

    def fold(w, b, scale, shift):
        return w * scale, b * scale + shift   # column-wise fold

    w0f, sh0 = fold(w0, b0, s0, t0)
    w1f, sh1 = fold(w1, b1, s1, t1)
    w2f, sh2 = fold(w2, b2, s2, t2)

    W = jnp.zeros((N_MATMULS, SLAB_K, SLAB_N), jnp.float32)
    W = W.at[0, :IN_FEATS, :HIDDEN_DIM].set(w0f)
    W = W.at[1, :HIDDEN_DIM, :HIDDEN_DIM].set(w1f)
    W = W.at[2, :HIDDEN_DIM, :HIDDEN_DIM].set(w2f)
    W = W.at[3, :HIDDEN_DIM, :OUT_FEATS].set(wo)
    W = W.astype(jnp.bfloat16)                 # MXU-native operand dtype

    S = jnp.zeros((N_MATMULS, 1, SLAB_N), jnp.float32)
    S = S.at[0, 0, :HIDDEN_DIM].set(sh0[0])
    S = S.at[1, 0, :HIDDEN_DIM].set(sh1[0])
    S = S.at[2, 0, :HIDDEN_DIM].set(sh2[0])
    S = S.at[3, 0, :OUT_FEATS].set(bo[0])
    return W, S


# ------------------------------ forward wrapper -------------------------------
def pred_model_forward(x, packed_params, *, batch_tile=None):
    """x: (B, input_dim, n_dim) f32  ->  (B, output_dim, n_dim) f32."""
    W, S = packed_params
    B = x.shape[0]
    x_flat = x.reshape(B, -1).astype(jnp.float32)
    assert x_flat.shape[1] == IN_FEATS

    if batch_tile is None:
        rounded = _round8(B)
        if rounded <= 512:
            # launch-overhead-bound regime: one grid step, whole batch in one tile
            batch_tile = rounded
        else:
            # >= 2 grid steps so v7x megacore can shard the "parallel" axis,
            # while keeping tiles large (<= 1024 rows) for v5e/v6e step-overhead amortization
            batch_tile = min(MAX_BATCH_TILE, _round8(-(-rounded // 2)))

    B_pad = -(-B // batch_tile) * batch_tile
    if B_pad != B:
        # pad batch rows only (32 lanes wide, cheap); keeps tail block fully defined
        x_flat = jnp.zeros((B_pad, IN_FEATS), jnp.float32).at[:B].set(x_flat)

    grid = (B_pad // batch_tile,)

    flops = 2 * B_pad * SLAB_K * SLAB_N * N_MATMULS
    bytes_accessed = (x_flat.size * 4          # f32 input
                      + W.size * 2             # bf16 weight slab
                      + S.size * 4             # f32 shifts
                      + B_pad * SLAB_N * 4)    # f32 output
    cost = pl.CostEstimate(flops=flops, transcendentals=0,
                           bytes_accessed=bytes_accessed)

    y_pad = pl.pallas_call(
        pred_mlp_kernel,
        out_shape=jax.ShapeDtypeStruct((B_pad, SLAB_N), jnp.float32),
        grid_spec=pltpu.PrefetchScalarGridSpec(
            num_scalar_prefetch=0,
            grid=grid,
            in_specs=[
                pl.BlockSpec((batch_tile, IN_FEATS), lambda i: (i, 0)),         # x tile
                pl.BlockSpec((N_MATMULS, SLAB_K, SLAB_N), lambda i: (0, 0, 0)),  # weight slab
                pl.BlockSpec((N_MATMULS, 1, SLAB_N), lambda i: (0, 0, 0)),       # shift slab
            ],
            out_specs=pl.BlockSpec((batch_tile, SLAB_N), lambda i: (i, 0)),
        ),
        compiler_params=pltpu.CompilerParams(
            dimension_semantics=("parallel",),
        ),
        cost_estimate=cost,
    )(x_flat, W, S)

    # slice away batch/output padding, then mirror y.reshape(batch_size, -1, n_dim)
    return y_pad[:B, :OUT_FEATS].reshape(B, -1, N_DIM)


# --------------------------- parameter construction --------------------------
def init_params(key):
    """Deterministic synthetic params matching the PyTorch module's shapes.
    BatchNorm1d (eval mode) is represented as per-feature scale/shift:
    scale = gamma / sqrt(var + eps), shift = beta - mean * scale."""
    def linear(key, fan_in, fan_out):
        kw, kb = jax.random.split(key)
        bound = 1.0 / jnp.sqrt(fan_in)
        w = jax.random.uniform(kw, (fan_in, fan_out), jnp.float32, -bound, bound)
        b = jax.random.uniform(kb, (1, fan_out), jnp.float32, -bound, bound)
        return w, b

    def batchnorm(key, feats):
        kg, kb, km, kv = jax.random.split(key, 4)
        gamma = 1.0 + 0.1 * jax.random.normal(kg, (1, feats), jnp.float32)
        beta = 0.1 * jax.random.normal(kb, (1, feats), jnp.float32)
        mean = 0.05 * jax.random.normal(km, (1, feats), jnp.float32)
        var = jnp.abs(1.0 + 0.1 * jax.random.normal(kv, (1, feats), jnp.float32))
        scale = gamma / jnp.sqrt(var + BN_EPS)
        shift = beta - mean * scale
        return scale, shift

    keys = jax.random.split(key, 8)
    w0, b0 = linear(keys[0], IN_FEATS, HIDDEN_DIM)
    s0, t0 = batchnorm(keys[1], HIDDEN_DIM)
    w1, b1 = linear(keys[2], HIDDEN_DIM, HIDDEN_DIM)
    s1, t1 = batchnorm(keys[3], HIDDEN_DIM)
    w2, b2 = linear(keys[4], HIDDEN_DIM, HIDDEN_DIM)
    s2, t2 = batchnorm(keys[5], HIDDEN_DIM)
    wo, bo = linear(keys[6], HIDDEN_DIM, OUT_FEATS)
    return (w0, b0, s0, t0, w1, b1, s1, t1, w2, b2, s2, t2, wo, bo)


# ------------------------------ pure-JAX reference ---------------------------
def reference_forward(x, params):
    (w0, b0, s0, t0, w1, b1, s1, t1, w2, b2, s2, t2, wo, bo) = params
    B = x.shape[0]
    h = x.reshape(B, -1)
    h = jnp.maximum((h @ w0 + b0) * s0 + t0, 0.0)
    h = jnp.maximum((h @ w1 + b1) * s1 + t1, 0.0)
    h = jnp.maximum((h @ w2 + b2) * s2 + t2, 0.0)
    y = h @ wo + bo
    return y.reshape(B, -1, N_DIM)


# ----------------------------------- main ------------------------------------
if __name__ == "__main__":
    key = jax.random.PRNGKey(0)
    kx, kp = jax.random.split(key)

    B = 8
    x = jax.random.normal(kx, (B, INPUT_DIM, N_DIM), jnp.float32)
    params = init_params(kp)
    packed = pack_params(params)

    y = pred_model_forward(x, packed)
    y = jax.block_until_ready(y)

    y_ref = reference_forward(x, params)
    assert y.shape == (B, OUTPUT_DIM, N_DIM), y.shape
    # matmul operands are bf16 (f32 accumulation), so compare with bf16-level tolerance
    err = float(jnp.max(jnp.abs(y - y_ref)))
    assert jnp.allclose(y, y_ref, atol=5e-2, rtol=5e-2), err

    # TODO(synk): Dropout / BatchNorm batch-statistics are training-mode only;
    # this kernel implements eval-mode (inference) semantics.
    print("KERNEL_OK")
</pallas_src>

<mosaic_0001>
module attributes {stable_mosaic.version = 11 : i64} {
  func.func @pred_mlp_kernel(%arg0: i32, %arg1: memref<8x32xf32, #tpu.memory_space<vmem>>, %arg2: memref<4x32x32xbf16, #tpu.memory_space<vmem>>, %arg3: memref<4x1x32xf32, #tpu.memory_space<vmem>>, %arg4: memref<8x32xf32, #tpu.memory_space<vmem>>) attributes {dimension_semantics = [#tpu.dimension_semantics<parallel>], iteration_bounds = array<i64: 1>, scalar_prefetch = 0 : i64, scratch_operands = 0 : i64, tpu.core_type = #tpu.core_type<tc>, window_params = [{transform_indices = @transform_0, window_bounds = array<i64: 8, 32>}, {pipeline_mode = #tpu.pipeline_mode<synchronous>, transform_indices = @transform_1, window_bounds = array<i64: 4, 32, 32>}, {pipeline_mode = #tpu.pipeline_mode<synchronous>, transform_indices = @transform_2, window_bounds = array<i64: 4, 1, 32>}, {transform_indices = @transform_3, window_bounds = array<i64: 8, 32>}]} {
    %c0 = arith.constant 0 : index
    %c0_0 = arith.constant 0 : index
    %0 = vector.load %arg1[%c0, %c0_0] : memref<8x32xf32, #tpu.memory_space<vmem>>, vector<8x32xf32>
    %1 = arith.truncf %0 : vector<8x32xf32> to vector<8x32xbf16>
    %c0_1 = arith.constant 0 : index
    %c0_2 = arith.constant 0 : index
    %c0_3 = arith.constant 0 : index
    %2 = vector.load %arg2[%c0_1, %c0_2, %c0_3] : memref<4x32x32xbf16, #tpu.memory_space<vmem>>, vector<1x32x32xbf16>
    %3 = vector.shape_cast %2 : vector<1x32x32xbf16> to vector<32x32xbf16>
    %cst = arith.constant dense<0.000000e+00> : vector<8x32xf32>
    %4 = tpu.matmul %1, %3, %cst {dimension_numbers = #tpu.dot_dimension_numbers<[1], [0], [0], [1], [0, 0, 1, 1], [], []>} : vector<8x32xbf16>, vector<32x32xbf16>, vector<8x32xf32> -> vector<8x32xf32>
    %c0_4 = arith.constant 0 : index
    %c0_5 = arith.constant 0 : index
    %c0_6 = arith.constant 0 : index
    %5 = vector.load %arg3[%c0_4, %c0_5, %c0_6] : memref<4x1x32xf32, #tpu.memory_space<vmem>>, vector<1x1x32xf32>
    %6 = vector.shape_cast %5 : vector<1x1x32xf32> to vector<1x32xf32>
    %7 = vector.broadcast %6 : vector<1x32xf32> to vector<8x32xf32>
    %8 = arith.addf %4, %7 : vector<8x32xf32>
    %cst_7 = arith.constant 0.000000e+00 : f32
    %9 = vector.broadcast %cst_7 : f32 to vector<8x32xf32>
    %10 = arith.maximumf %8, %9 : vector<8x32xf32>
    %11 = arith.truncf %10 : vector<8x32xf32> to vector<8x32xbf16>
    %c1 = arith.constant 1 : index
    %c0_8 = arith.constant 0 : index
    %c0_9 = arith.constant 0 : index
    %12 = vector.load %arg2[%c1, %c0_8, %c0_9] : memref<4x32x32xbf16, #tpu.memory_space<vmem>>, vector<1x32x32xbf16>
    %13 = vector.shape_cast %12 : vector<1x32x32xbf16> to vector<32x32xbf16>
    %cst_10 = arith.constant dense<0.000000e+00> : vector<8x32xf32>
    %14 = tpu.matmul %11, %13, %cst_10 {dimension_numbers = #tpu.dot_dimension_numbers<[1], [0], [0], [1], [0, 0, 1, 1], [], []>} : vector<8x32xbf16>, vector<32x32xbf16>, vector<8x32xf32> -> vector<8x32xf32>
    %c1_11 = arith.constant 1 : index
    %c0_12 = arith.constant 0 : index
    %c0_13 = arith.constant 0 : index
    %15 = vector.load %arg3[%c1_11, %c0_12, %c0_13] : memref<4x1x32xf32, #tpu.memory_space<vmem>>, vector<1x1x32xf32>
    %16 = vector.shape_cast %15 : vector<1x1x32xf32> to vector<1x32xf32>
    %17 = vector.broadcast %16 : vector<1x32xf32> to vector<8x32xf32>
    %18 = arith.addf %14, %17 : vector<8x32xf32>
    %cst_14 = arith.constant 0.000000e+00 : f32
    %19 = vector.broadcast %cst_14 : f32 to vector<8x32xf32>
    %20 = arith.maximumf %18, %19 : vector<8x32xf32>
    %21 = arith.truncf %20 : vector<8x32xf32> to vector<8x32xbf16>
    %c2 = arith.constant 2 : index
    %c0_15 = arith.constant 0 : index
    %c0_16 = arith.constant 0 : index
    %22 = vector.load %arg2[%c2, %c0_15, %c0_16] : memref<4x32x32xbf16, #tpu.memory_space<vmem>>, vector<1x32x32xbf16>
    %23 = vector.shape_cast %22 : vector<1x32x32xbf16> to vector<32x32xbf16>
    %cst_17 = arith.constant dense<0.000000e+00> : vector<8x32xf32>
    %24 = tpu.matmul %21, %23, %cst_17 {dimension_numbers = #tpu.dot_dimension_numbers<[1], [0], [0], [1], [0, 0, 1, 1], [], []>} : vector<8x32xbf16>, vector<32x32xbf16>, vector<8x32xf32> -> vector<8x32xf32>
    %c2_18 = arith.constant 2 : index
    %c0_19 = arith.constant 0 : index
    %c0_20 = arith.constant 0 : index
    %25 = vector.load %arg3[%c2_18, %c0_19, %c0_20] : memref<4x1x32xf32, #tpu.memory_space<vmem>>, vector<1x1x32xf32>
    %26 = vector.shape_cast %25 : vector<1x1x32xf32> to vector<1x32xf32>
    %27 = vector.broadcast %26 : vector<1x32xf32> to vector<8x32xf32>
    %28 = arith.addf %24, %27 : vector<8x32xf32>
    %cst_21 = arith.constant 0.000000e+00 : f32
    %29 = vector.broadcast %cst_21 : f32 to vector<8x32xf32>
    %30 = arith.maximumf %28, %29 : vector<8x32xf32>
    %31 = arith.truncf %30 : vector<8x32xf32> to vector<8x32xbf16>
    %c3 = arith.constant 3 : index
    %c0_22 = arith.constant 0 : index
    %c0_23 = arith.constant 0 : index
    %32 = vector.load %arg2[%c3, %c0_22, %c0_23] : memref<4x32x32xbf16, #tpu.memory_space<vmem>>, vector<1x32x32xbf16>
    %33 = vector.shape_cast %32 : vector<1x32x32xbf16> to vector<32x32xbf16>
    %cst_24 = arith.constant dense<0.000000e+00> : vector<8x32xf32>
    %34 = tpu.matmul %31, %33, %cst_24 {dimension_numbers = #tpu.dot_dimension_numbers<[1], [0], [0], [1], [0, 0, 1, 1], [], []>} : vector<8x32xbf16>, vector<32x32xbf16>, vector<8x32xf32> -> vector<8x32xf32>
    %c3_25 = arith.constant 3 : index
    %c0_26 = arith.constant 0 : index
    %c0_27 = arith.constant 0 : index
    %35 = vector.load %arg3[%c3_25, %c0_26, %c0_27] : memref<4x1x32xf32, #tpu.memory_space<vmem>>, vector<1x1x32xf32>
    %36 = vector.shape_cast %35 : vector<1x1x32xf32> to vector<1x32xf32>
    %37 = vector.broadcast %36 : vector<1x32xf32> to vector<8x32xf32>
    %38 = arith.addf %34, %37 : vector<8x32xf32>
    %c0_28 = arith.constant 0 : index
    %c0_29 = arith.constant 0 : index
    %39 = vector.load %arg4[%c0_28, %c0_29] : memref<8x32xf32, #tpu.memory_space<vmem>>, vector<8x32xf32>
    tpu.vector_store %arg4[%c0_28, %c0_29], %38 {strides = array<i32>} : memref<8x32xf32, #tpu.memory_space<vmem>>, vector<8x32xf32>,
    return
  }
  func.func @transform_0(%arg0: i32) -> (i32, i32) {
    %c0_i32 = arith.constant 0 : i32
    %c0_i32_0 = arith.constant 0 : i32
    return %arg0, %c0_i32 : i32, i32
  }
  func.func @transform_1(%arg0: i32) -> (i32, i32, i32) {
    %c0_i32 = arith.constant 0 : i32
    %c0_i32_0 = arith.constant 0 : i32
    %c0_i32_1 = arith.constant 0 : i32
    %c0_i32_2 = arith.constant 0 : i32
    return %c0_i32, %c0_i32_0, %c0_i32_1 : i32, i32, i32
  }
  func.func @transform_2(%arg0: i32) -> (i32, i32, i32) {
    %c0_i32 = arith.constant 0 : i32
    %c0_i32_0 = arith.constant 0 : i32
    %c0_i32_1 = arith.constant 0 : i32
    %c0_i32_2 = arith.constant 0 : i32
    return %c0_i32, %c0_i32_0, %c0_i32_1 : i32, i32, i32
  }
  func.func @transform_3(%arg0: i32) -> (i32, i32) {
    %c0_i32 = arith.constant 0 : i32
    %c0_i32_0 = arith.constant 0 : i32
    return %arg0, %c0_i32 : i32, i32
  }
}

</mosaic_0001>

<bundles_post_ra>
// kernel: tpu_custom_call.1
= control target key start
LH: loop header
LB: loop body
LE: loop exit
PB: predicated region body
PF: predicated region fallthrough
CT: control target
= control target key end

     0   :  { %8 = vsyncpa [#allocation3], 0  ;;  %s579_s0 = inlined_call_operand.hbm [shape: f32[8,32], index: 0, kind: input, shape index: {}]   ;;  %s580_s1 = inlined_call_operand.hbm [shape: bf16[4,32,32], index: 1, kind: input, shape index: {}]   ;;  %s581_s2 = inlined_call_operand.vmem [shape: f32[4,1,32], index: 2, kind: input, shape index: {}]   ;;  %s582_s3 = inlined_call_operand.hbm [shape: f32[8,32], index: 3, kind: output, shape index: {}]  }
   0x1   :  { %9 = vsyncpa [#allocation6], 0 }
   0x2   :  { %10 = vsyncpa [#allocation4], 0  ;;  %s488_s12 = smov [#allocation2]   ;;  %s489_s14 = smov [#allocation5]  }
   0x3   :  { %s17_s13 = sshll.u32 %s488_s12, 4  ;;  %s26_s15 = sshll.u32 %s489_s14, 4  ;;  %s18_s13 = int_to_ptr.vmem [resolvable:$true] %s17_s13  ;;  %s515_s15 = int_to_ptr.vmem [resolvable:$true] %s26_s15 }
   0x4   :  { %s416_s18 = scalar_lea.hbm %s579_s0, 128 }
   0x5   :  { %p417_p0 = scmp.ne.s32.totalorder %s579_s0, %s416_s18  ;;  %p420_p1 = scmp.lt.u32.totalorder %s416_s18, %s579_s0 }
   0x7   :  { %p422_p2 = pnand %p420_p1, %p417_p0 }
   0x9   :  { %425 = shalt.err (!%p422_p2)
}
   0xa   :  { %s426_s23 = scalar_lea.vmem %s18_s13, 128  ;;  %p431_p4 = scmp.lt.s32.totalorder %s18_s13, %s18_s13 }
   0xb   :  { %p427_p3 = scmp.ne.s32.totalorder %s18_s13, %s426_s23  ;;  %p432_p5 = scmp.lt.s32.totalorder %s426_s23, %s426_s23 }
   0xd   :  { %p433_p6 = por %p432_p5, %p431_p4 }
   0xf   :  { %p434_p7 = pnand %p433_p6, %p427_p3 }
  0x11   :  { %437 = shalt.err (!%p434_p7)
}
  0x12   :  { %20 = dma.hbm_to_vmem [thread:$0]  %s579_s0, 128, %s18_s13, [#allocation3]  }
  0x13   :  { %s438_s28 = scalar_lea.hbm %s580_s1, 1024 }
  0x14   :  { %p439_p8 = scmp.ne.s32.totalorder %s580_s1, %s438_s28  ;;  %p442_p9 = scmp.lt.u32.totalorder %s438_s28, %s580_s1 }
  0x16   :  { %p444_p10 = pnand %p442_p9, %p439_p8 }
  0x18   :  { %447 = shalt.err (!%p444_p10)
}
  0x19   :  { %s448_s6 = scalar_lea.vmem %s515_s15, 1024  ;;  %p453_p12 = scmp.lt.s32.totalorder %s515_s15, %s515_s15 }
  0x1a   :  { %p449_p11 = scmp.ne.s32.totalorder %s515_s15, %s448_s6  ;;  %p454_p13 = scmp.lt.s32.totalorder %s448_s6, %s448_s6 }
  0x1c   :  { %p455_p0 = por %p454_p13, %p453_p12 }
  0x1e   :  { %p456_p1 = pnand %p455_p0, %p449_p11 }
  0x20   :  { %459 = shalt.err (!%p456_p1)
}
  0x21   :  { %s490_s0 = smov 64   ;;  %s491_s7 = smov 4  }
  0x22   :  { %32 = dma.hbm_to_vmem [thread:$0]  %s580_s1, 1024, %s515_s15, [#allocation6], %s490_s0, %s490_s0, %s491_s7  }
  0x23   :  { %482 = dma.done.wait [#allocation3], 128  }
  0x24   :  { %483 = vsyncadd [#allocation3], 4294967168 }
  0x25   :  { %484 = dma.done.wait [#allocation6], 1024  }
  0x26   :  { %485 = vsyncadd [#allocation6], 4294966272  ;;  %v492_v0 = vmov 0.0   ;;  %vm493_vm0 = vmmov 0   ;;  %v408_v1 = vld [vmem:[#allocation5] sm:$0xff]   ;;  %v409_v2 = vld [vmem:[#allocation5 + $0x8] sm:$0xff]  }
  0x27   :  { %369 = vmatprep.subr.bf16.mxu0 %v492_v0  ;;  %373 = vmatprep.mubr.msk.bf16.mxu0 %vm493_vm0, %v492_v0  ;;  %v42_v3 = vld [vmem:[#allocation2] sm:$0xff]  ;;  %vm67_vm1 = vcmask 261120   ;;  %v410_v5 = vld [vmem:[#allocation5 + $0x10] sm:$0xff]   ;;  %v412_v7 = vld [vmem:[#allocation5 + $0x20] sm:$0xff]   ;;  %s494_s17 = smov [#allocation7]  }
  0x28   :  { %377 = vmatprep.subr.bf16.mxu1 %v492_v0  ;;  %381 = vmatprep.mubr.msk.bf16.mxu1 %vm493_vm0, %v492_v0  ;;  %v43_v4 = vpack.c.bf16 %v42_v3, %v42_v3  ;;  %v411_v6 = vld [vmem:[#allocation5 + $0x18] sm:$0xff]   ;;  %v413_v16 = vld [vmem:[#allocation5 + $0x28] sm:$0xff]   ;;  %v414_v17 = vld [vmem:[#allocation5 + $0x30] sm:$0xff]   ;;  %s328_s18 = sshll.u32 %s494_s17, 4  ;;  %s329_s18 = int_to_ptr.vmem [resolvable:$true] %s328_s18 }
  0x29   :  { %370 = vmatpush3.bf16.msra.mxu0 %v408_v1  ;;  %378 = vmatpush3.bf16.msra.mxu1 %v410_v5  ;;  %v338_v8 = vld [vmem:[%s581_s2] ss:$0 sm:$0xff]  ;;  %v343_v18 = vld [vmem:[%s581_s2 + $0x1] ss:$0 sm:$0xff]  ;;  %v348_v27 = vld [vmem:[%s581_s2 + $0x2] ss:$0 sm:$0xff]  ;;  %p465_p3 = scmp.lt.s32.totalorder %s329_s18, %s329_s18 }
  0x2a   :  { %371 = vmatprep.subr.bf16.mxu0 %v492_v0  ;;  %379 = vmatprep.subr.bf16.mxu1 %v492_v0  ;;  %v415_v26 = vld [vmem:[#allocation5 + $0x38] sm:$0xff]   ;;  %s460_s19 = scalar_lea.vmem %s329_s18, 128 }
  0x2b   :  { %v353_v35 = vld [vmem:[%s581_s2 + $0x3] ss:$0 sm:$0xff]  ;;  %p461_p2 = scmp.ne.s32.totalorder %s329_s18, %s460_s19  ;;  %p466_p4 = scmp.lt.s32.totalorder %s460_s19, %s460_s19 }
  0x2d   :  { %372 = vmatpush3.bf16.msra.mxu0 %v409_v2  ;;  %380 = vmatpush3.bf16.msra.mxu1 %v411_v6  ;;  %p467_p5 = por %p466_p4, %p465_p3 }
  0x2e   :  { %385 = vmatprep.subr.bf16.mxu0 %v492_v0  ;;  %393 = vmatprep.subr.bf16.mxu1 %v492_v0 }
  0x2f   :  { %p468_p6 = pnand %p467_p5, %p461_p2 }
  0x30   :  { %374 = vmatmul.mubr.msk.bf16.vlgmr.msra.gmra.mrb[0].mxu0 %vm67_vm1, %v43_v4 }
  0x31   :  { %389 = vmatprep.mubr.msk.bf16.mxu0 %vm493_vm0, %v492_v0  ;;  %386 = vmatpush3.bf16.msra.mxu0 %v412_v7 }
  0x32   :  { %387 = vmatprep.subr.bf16.mxu0 %v492_v0 }
  0x35   :  { %388 = vmatpush3.bf16.msra.mxu0 %v413_v16 }
 0x103   :  { %v105_v9 = vpop.f32.mrb[0].mxu0 }
 0x104   :  { %v106_v10 = vadd.f32 %v338_v8, %v105_v9  ;;  %v375_v11 = vpop.f32.mrb[1].mxu0 }
 0x105   :  { %v108_v12 = vpop.f32.mrb[2].mxu0 }
 0x106   :  { %v111_v13 = vmax.f32 %v106_v10, 0.0  ;;  %v376_v14 = vpop.f32.mrb[3].mxu0 }
 0x108   :  { %v112_v15 = vpack.c.bf16 %v111_v13, %v111_v13 }
 0x10a   :  { %382 = vmatmul.mubr.msk.bf16.vlgmr.msra.gmra.mrb[0].mxu1 %vm67_vm1, %v112_v15 }
 0x10b   :  { %397 = vmatprep.mubr.msk.bf16.mxu1 %vm493_vm0, %v492_v0  ;;  %394 = vmatpush3.bf16.msra.mxu1 %v414_v17 }
 0x10c   :  { %395 = vmatprep.subr.bf16.mxu1 %v492_v0 }
 0x10f   :  { %396 = vmatpush3.bf16.msra.mxu1 %v415_v26 }
 0x1dd   :  { %v175_v19 = vpop.f32.mrb[0].mxu1 }
 0x1de   :  { %v176_v20 = vadd.f32 %v343_v18, %v175_v19  ;;  %v383_v21 = vpop.f32.mrb[1].mxu1 }
 0x1df   :  { %v178_v22 = vpop.f32.mrb[2].mxu1 }
 0x1e0   :  { %v181_v23 = vmax.f32 %v176_v20, 0.0  ;;  %v384_v24 = vpop.f32.mrb[3].mxu1 }
 0x1e2   :  { %v182_v25 = vpack.c.bf16 %v181_v23, %v181_v23 }
 0x1e4   :  { %390 = vmatmul.mubr.msk.bf16.vlgmr.msra.gmra.mrb[4].mxu0 %vm67_vm1, %v182_v25 }
 0x2b7   :  { %v245_v28 = vpop.f32.mrb[4].mxu0 }
 0x2b8   :  { %v246_v29 = vadd.f32 %v348_v27, %v245_v28  ;;  %v391_v30 = vpop.f32.mrb[5].mxu0 }
 0x2b9   :  { %v248_v31 = vpop.f32.mrb[6].mxu0 }
 0x2ba   :  { %v251_v32 = vmax.f32 %v246_v29, 0.0  ;;  %v392_v33 = vpop.f32.mrb[7].mxu0 }
 0x2bc   :  { %v252_v34 = vpack.c.bf16 %v251_v32, %v251_v32 }
 0x2be   :  { %398 = vmatmul.mubr.msk.bf16.vlgmr.msra.gmra.mrb[4].mxu1 %vm67_vm1, %v252_v34 }
 0x391   :  { %v315_v36 = vpop.f32.mrb[4].mxu1 }
 0x392   :  { %v316_v37 = vadd.f32 %v353_v35, %v315_v36  ;;  %v399_v38 = vpop.f32.mrb[5].mxu1 }
 0x393   :  { %v318_v39 = vpop.f32.mrb[6].mxu1 }
 0x394   :  { %321 = vst.msk [vmem:[#allocation7] sm:$0xff] %vm67_vm1, %v316_v37  ;;  %v400_v40 = vpop.f32.mrb[7].mxu1 }
 0x395   :  { %471 = shalt.err (!%p468_p6)
}
 0x396   :  { %s472_s2 = scalar_lea.hbm %s582_s3, 128 }
 0x397   :  { %p473_p7 = scmp.ne.s32.totalorder %s582_s3, %s472_s2  ;;  %p476_p8 = scmp.lt.u32.totalorder %s472_s2, %s582_s3 }
 0x399   :  { %p478_p9 = pnand %p476_p8, %p473_p7 }
 0x39b   :  { %481 = shalt.err (!%p478_p9)
}
 0x39c   :  { %331 = dma.vmem_to_hbm [thread:$0]  %s329_s18, 128, %s582_s3, [#allocation4]  }
 0x39d   :  { %486 = dma.done.wait [#allocation4], 128  }
 0x39e   :  { %487 = vsyncadd [#allocation4], 4294967168 }
 0x39f   :  { %335 = vsyncpa [#allocation3], 1 }
 0x3a0   :  { %336 = vsyncpa [#allocation6], 1 }
 0x3a1   :  { %337 = vsyncpa [#allocation4], 1 }

</bundles_post_ra>
